<compile_context>
chip_gen: v6e
topology: v6e:2x2x1
jax: 0.10.0
libtpu: 0.0.40
codegen_flags: <defaults>
</compile_context>

<pallas_src>
import jax
import jax.numpy as jnp
from jax.experimental import pallas as pl
from jax.experimental.pallas import tpu as pltpu

LANE = 128


def dynamic_recalibration_kernel(x_ref, p_ref, o_ref):
    # x_ref: (Ct, HW_p) lane-dense tile (batch dim squeezed away)
    # p_ref: (Ct, 2)    packed per-channel [weight, bias] in f32
    x = x_ref[...].astype(jnp.float32)
    w = p_ref[:, 0:1].astype(jnp.float32)        # (Ct, 1)
    b = p_ref[:, 1:2].astype(jnp.float32)        # (Ct, 1)
    se = jax.nn.sigmoid(x * w + b)               # depthwise 1x1 conv + sigmoid
    o_ref[...] = (x * se + x).astype(o_ref.dtype)


def _pick_channel_block(C, B, tile_budget, bytes_per_row, target_steps=8):
    """Largest channel block that fits the VMEM budget, capped so the grid has
    enough steps to pipeline (and to shard across v7x's two TensorCores)."""
    ct = max(1, tile_budget // bytes_per_row)
    if B < target_steps:
        want_c_steps = -(-target_steps // B)          # ceil
        ct = min(ct, -(-C // want_c_steps))           # ceil
    if ct >= C:
        return C
    ct = max(8, (ct // 8) * 8)                        # (8,128) rule: mult of 8
    return C if ct >= C else ct


def dynamic_recalibration(x, w_dw, b_dw):
    """Pallas implementation of DynamicRecalibration.

    x:    (B, C, H, W)
    w_dw: depthwise 1x1 conv weight, reshapeable to (C,)  (PyTorch: (C,1,1,1))
    b_dw: depthwise 1x1 conv bias, shape (C,)
    """
    B, C, H, W = x.shape
    HW = H * W
    HW_p = max(LANE, ((HW + LANE - 1) // LANE) * LANE)

    x3 = x.reshape(B, C, HW)
    if HW_p != HW:
        # Keep the output lane dim a multiple of 128 (unmasked stores).
        x3 = jnp.pad(x3, ((0, 0), (0, 0), (0, HW_p - HW)))

    # Packed per-channel params, kept in f32 (tiny; matches PyTorch precision).
    p = jnp.concatenate(
        [w_dw.reshape(C, 1), b_dw.reshape(C, 1)], axis=1).astype(jnp.float32)

    # --- VMEM-aware channel-block sizing -------------------------------------
    itemsize = x.dtype.itemsize
    try:
        vmem_phys = pltpu.get_tpu_info().vmem_capacity_bytes
    except Exception:
        vmem_phys = 64 << 20  # conservative fallback (v7x per-TC size)
    vmem_limit = int(min(32 << 20, vmem_phys // 2))
    tile_budget = vmem_limit // 2  # headroom for Mosaic internal scratch etc.

    # Double-buffered footprint per channel-row inside one block:
    #   x in + out tiles : 2 bufs * 2 arrays * HW_p * itemsize
    #   packed params    : 2 bufs * 128 (lane-padded) * 4 B
    bytes_per_row = 4 * HW_p * itemsize + 2 * LANE * 4

    Ct = _pick_channel_block(C, B, tile_budget, bytes_per_row)
    grid = (B, pl.cdiv(C, Ct))

    out3 = pl.pallas_call(
        dynamic_recalibration_kernel,
        out_shape=jax.ShapeDtypeStruct((B, C, HW_p), x.dtype),
        grid=grid,
        in_specs=[
            pl.BlockSpec((None, Ct, HW_p), lambda b, c: (b, c, 0)),
            pl.BlockSpec((Ct, 2), lambda b, c: (c, 0)),
        ],
        out_specs=pl.BlockSpec((None, Ct, HW_p), lambda b, c: (b, c, 0)),
        compiler_params=pltpu.CompilerParams(
            dimension_semantics=("parallel", "parallel"),
            vmem_limit_bytes=vmem_limit,
        ),
    )(x3, p)

    if HW_p != HW:
        out3 = out3[:, :, :HW]
    return out3.reshape(B, C, H, W)


def dynamic_recalibration_reference(x, w_dw, b_dw):
    """Pure-JAX reference matching the PyTorch forward."""
    B, C, H, W = x.shape
    se = jax.nn.sigmoid(x * w_dw.reshape(1, C, 1, 1) + b_dw.reshape(1, C, 1, 1))
    return x * se + x


if __name__ == "__main__":
    B, C, H, W = 2, 4, 16, 16
    key = jax.random.PRNGKey(0)
    kx, kw, kb = jax.random.split(key, 3)

    x = jax.random.normal(kx, (B, C, H, W), jnp.float32)
    # PyTorch parameter shapes: depthwise_conv.weight (C,1,1,1), .bias (C,)
    w_dw = jax.random.normal(kw, (C, 1, 1, 1), jnp.float32) * 0.5
    b_dw = jax.random.normal(kb, (C,), jnp.float32) * 0.1

    out = dynamic_recalibration(x, w_dw, b_dw)
    out = jax.block_until_ready(out)

    ref = dynamic_recalibration_reference(x, w_dw, b_dw)
    assert out.shape == (B, C, H, W)
    assert jnp.allclose(out, ref, atol=1e-5, rtol=1e-5), (
        f"mismatch, max abs err = {jnp.max(jnp.abs(out - ref))}")
    print("KERNEL_OK")
</pallas_src>

<mosaic_0001>
module attributes {stable_mosaic.version = 11 : i64} {
  func.func @dynamic_recalibration_kernel(%arg0: i32, %arg1: i32, %arg2: memref<1x4x256xf32, #tpu.memory_space<vmem>>, %arg3: memref<4x2xf32, #tpu.memory_space<vmem>>, %arg4: memref<1x4x256xf32, #tpu.memory_space<vmem>>) attributes {dimension_semantics = [#tpu.dimension_semantics<parallel>, #tpu.dimension_semantics<parallel>], iteration_bounds = array<i64: 2, 1>, scalar_prefetch = 0 : i64, scratch_operands = 0 : i64, tpu.core_type = #tpu.core_type<tc>, window_params = [{transform_indices = @transform_0, window_bounds = array<i64: 1, 4, 256>}, {transform_indices = @transform_1, window_bounds = array<i64: 4, 2>}, {transform_indices = @transform_2, window_bounds = array<i64: 1, 4, 256>}]} {
    %c0 = arith.constant 0 : index
    %c0_0 = arith.constant 0 : index
    %c0_1 = arith.constant 0 : index
    %0 = vector.load %arg2[%c0, %c0_0, %c0_1] : memref<1x4x256xf32, #tpu.memory_space<vmem>>, vector<1x4x256xf32>
    %1 = vector.shape_cast %0 : vector<1x4x256xf32> to vector<4x256xf32>
    %c0_2 = arith.constant 0 : index
    %c0_3 = arith.constant 0 : index
    %2 = vector.load %arg3[%c0_2, %c0_3] : memref<4x2xf32, #tpu.memory_space<vmem>>, vector<4x1xf32>
    %c0_4 = arith.constant 0 : index
    %c1 = arith.constant 1 : index
    %3 = vector.load %arg3[%c0_4, %c1] : memref<4x2xf32, #tpu.memory_space<vmem>>, vector<4x1xf32>
    %4 = vector.broadcast %2 : vector<4x1xf32> to vector<4x256xf32>
    %5 = arith.mulf %1, %4 : vector<4x256xf32>
    %6 = vector.broadcast %3 : vector<4x1xf32> to vector<4x256xf32>
    %7 = arith.addf %5, %6 : vector<4x256xf32>
    %8 = arith.negf %7 : vector<4x256xf32>
    %9 = math.exp %8 : vector<4x256xf32>
    %cst = arith.constant 1.000000e+00 : f32
    %10 = vector.broadcast %cst : f32 to vector<4x256xf32>
    %11 = arith.addf %10, %9 : vector<4x256xf32>
    %12 = arith.divf %10, %11 : vector<4x256xf32>
    %13 = arith.mulf %1, %12 : vector<4x256xf32>
    %14 = arith.addf %13, %1 : vector<4x256xf32>
    %c0_5 = arith.constant 0 : index
    %c0_6 = arith.constant 0 : index
    %c0_7 = arith.constant 0 : index
    %15 = vector.load %arg4[%c0_5, %c0_6, %c0_7] : memref<1x4x256xf32, #tpu.memory_space<vmem>>, vector<1x4x256xf32>
    %16 = vector.shape_cast %15 : vector<1x4x256xf32> to vector<4x256xf32>
    %17 = vector.shape_cast %14 : vector<4x256xf32> to vector<1x4x256xf32>
    tpu.vector_store %arg4[%c0_5, %c0_6, %c0_7], %17 {strides = array<i32>} : memref<1x4x256xf32, #tpu.memory_space<vmem>>, vector<1x4x256xf32>,
    return
  }
  func.func @transform_0(%arg0: i32, %arg1: i32) -> (i32, i32, i32) {
    %c0_i32 = arith.constant 0 : i32
    %c0_i32_0 = arith.constant 0 : i32
    return %arg0, %arg1, %c0_i32 : i32, i32, i32
  }
  func.func @transform_1(%arg0: i32, %arg1: i32) -> (i32, i32) {
    %c0_i32 = arith.constant 0 : i32
    %c0_i32_0 = arith.constant 0 : i32
    return %arg1, %c0_i32 : i32, i32
  }
  func.func @transform_2(%arg0: i32, %arg1: i32) -> (i32, i32, i32) {
    %c0_i32 = arith.constant 0 : i32
    %c0_i32_0 = arith.constant 0 : i32
    return %arg0, %arg1, %c0_i32 : i32, i32, i32
  }
}

</mosaic_0001>

<bundles_post_ra>
// kernel: tpu_custom_call.1
= control target key start
LH: loop header
LB: loop body
LE: loop exit
PB: predicated region body
PF: predicated region fallthrough
CT: control target
= control target key end

     0   :  { %7 = vsyncpa [#allocation3], 0  ;;  %s708_s0 = inlined_call_operand.hbm [shape: f32[2,4,256], index: 0, kind: input, shape index: {}]   ;;  %s709_s1 = inlined_call_operand.vmem [shape: f32[4,2], index: 1, kind: input, shape index: {}]   ;;  %s710_s2 = inlined_call_operand.hbm [shape: f32[2,4,256], index: 2, kind: output, shape index: {}]  }
   0x1   :  { %9 = vsyncpa [#allocation3 + $0x1], 0 }
   0x2   :  { %10 = vsyncpa [#allocation4], 0 }
   0x3   :  { %12 = vsyncpa [#allocation4 + $0x1], 0  ;;  %s567_s9 = smov 0   ;;  %s569_s10 = smov 0  }
   0x4   :  { %s571_s11 = smov 0   ;;  %s573_s12 = smov 0  }
   0x5   :  { %s575_s13 = smov 0   ;;  %s577_s14 = smov 0  }
   0x6 LB: > { %s347_s15 = sadd.s32 4294967295, %s545_s14   ;;  %s348_s16 = sadd.s32 4294967294, %s545_s14   ;;  %s545_s14 = sphi %s577_s14, %s18_s14   ;;  %s541_s13 = sphi %s575_s13, %s722_s13   ;;  %s537_s12 = sphi %s573_s12, %s721_s12   ;;  %s533_s11 = sphi %s571_s11, %s720_s11   ;;  %s529_s10 = sphi %s569_s10, %s719_s10   ;;  %s525_s9 = sphi %s567_s9, %s718_s9  }
   0x7   : > { %s30_s17 = sadd.s32 1, %s541_s13  ;;  %s39_s18 = sadd.s32 1, %s533_s11 }
   0x8   : > { %p32_p0 = scmp.ge.s32.totalorder %s30_s17, 2  ;;  %p46_p1 = scmp.ne.s32.totalorder %s533_s11, %s529_s10 }
   0x9   : > { %p47_p2 = scmp.eq.s32.totalorder %s545_s14, 0  ;;  %p52_p3 = scmp.ne.s32.totalorder %s529_s10, %s525_s9 }
   0xa   : > { %s724_s17 = smov (%p32_p0, %s30_s17), 0  ;;  %p53_p5 = scmp.eq.s32.totalorder %s347_s15, 0 }
   0xb   : > { %p608_p4 = por %p47_p2, %p46_p1  ;;  %s34_s20 = ssub.s32 %s541_s13, %s724_s17 }
   0xc   : > { %p104_p6 = scmp.eq.s32.totalorder %s347_s15, 1  ;;  %p37_p7 = scmp.eq.s32.totalorder %s34_s20, 0 }
   0xd   : > { %p614_p8 = por %p53_p5, %p52_p3  ;;  %p110_p10 = scmp.eq.s32.totalorder %s348_s16, 1 }
   0xe   : > { %p618_p9 = por %p104_p6, %p46_p1  ;;  %p378_p13 = scmp.lt.s32.totalorder %s545_s14, 2 }
   0xf   : > { %s623_s23 = scalar_select %p37_p7, %s533_s11, %s39_s18  }
  0x10   : > { %p625_p11 = por %p110_p10, %p52_p3  ;;  %s137_s25 = sand.u32 1, %s533_s11  }
  0x11   : > { %s352_s26 = sshll.u32 %s137_s25, 3  ;;  %s364_s27 = sshll.u32 %s541_s13, 7 }
  0x12   : > { %s714_s24 = scalar_select %p625_p11, 1, 0 }
  0x13   : > { %s149_s30 = scalar_lea.hbm %s708_s0, %s364_s27  ;;  %s141_s3 = scalar_lea.vmem [#allocation2], %s352_s26 }
  0x14   : > { %s151_s4 = sshll.u32 %s141_s3, 4  ;;  %p638_p0 = pnand %p378_p13, %p608_p4  ;;  %s152_s4 = int_to_ptr.vmem [resolvable:$true] %s151_s4 }
  0x15   : > { %p355_p1 = scmp.ge.s32.totalorder %s545_s14, 1  ;;  %p156_p2 = scmp.lt.s32.totalorder %s545_s14, 3 }
  0x16   : > { %s138_s6 = scalar_lea.sflag [#allocation3], %s137_s25  ;;  %p439_p3 = pneg %p638_p0 }
  0x17   : > { %s450_s7 = scalar_lea.vmem %s152_s4, 128  ;;  %s547_s8 = smov [#allocation2]  }
  0x18   : > { %p451_p5 = scmp.ne.s32.totalorder %s152_s4, %s450_s7  ;;  %s455_s15 = sshll.u32 %s547_s8, 4  ;;  %s456_s15 = int_to_ptr.vmem [resolvable:$false] %s455_s15 }
  0x19   : > { %s457_s16 = scalar_lea.vmem %s456_s15, 256  ;;  %p458_p10 = scmp.lt.s32.totalorder %s152_s4, %s456_s15 }
  0x1a   : > { %p453_p6 = pnand %p451_p5, %p439_p3  ;;  %p459_p12 = scmp.lt.s32.totalorder %s457_s16, %s450_s7 }
  0x1c   : > { %p454_p7 = pneg %p453_p6  ;;  %p460_p4 = por %p459_p12, %p458_p10 }
  0x1e   : > { %p461_p13 = pnand %p460_p4, %p454_p7 }
  0x20   : > { %464 = shalt.err (!%p461_p13)
}
  0x21   : > { %373 = dma.hbm_to_vmem [thread:$0]  (!%p638_p0), %s149_s30, 128, %s152_s4, %s138_s6  }
  0x22   : > { %p157_p11 = pnand %p355_p1, %p156_p2 }
  0x23   : > { %s653_s18 = sand.u32 (!%p157_p11), 1, %s529_s10  }
  0x24   : > { %160 = sbr.rel (%p157_p11) target bundleno = 226 (0xe2), region = 28  ;;  %s356_s19 = sshll.u32 (!%p157_p11), %s653_s18, 3 }
  0x25   : > { %s163_s20 = scalar_lea.sflag (!%p157_p11), [#allocation3], %s653_s18  ;;  %s166_s25 = scalar_lea.vmem (!%p157_p11), [#allocation2], %s356_s19 }
  0x29   : > { %516 = dma.done.wait (%p614_p8), %s163_s20, 128  }
  0x2a   : > { %518 = vsyncadd (%p614_p8), %s163_s20, 4294967168  ;;  %v548_v0 = vmov 0   ;;  %v196_v1 = vld [vmem:[%s709_s1] sm:$0xf]  ;;  %v549_v2 = vmov 1   ;;  %v204_v5 = vlaneseq  ;;  %s365_s21 = sshll.u32 %s537_s12, 7 }
  0x2b   : > { %431 = vset.pattern.permute.xlu0 %v548_v0  ;;  %v550_v3 = vmov 839922192   ;;  %v195_v11 = vld [vmem:[%s166_s25] sm:$0xff]  ;;  %s190_s28 = scalar_lea.vmem [#allocation5], %s356_s19  ;;  %s246_s4 = scalar_lea.hbm %s710_s2, %s365_s21 }
  0x2c   : > { %199 = vperm.xlu0 %431, %v196_v1   ;;  %v202_v4 = vunpack.c.l.s4 %v550_v3  ;;  %v205_v7 = vshrl.u32 %v204_v5, 7  ;;  %s248_s29 = sshll.u32 %s190_s28, 4  ;;  %s232_s5 = scalar_lea.sflag [#allocation4], %s653_s18  ;;  %s249_s29 = int_to_ptr.vmem [resolvable:$true] %s248_s29 }
  0x2d   : > { %s465_s6 = scalar_lea.vmem %s249_s29, 128  ;;  %s551_s7 = smov [#allocation5]  }
  0x2e   : > { %v203_v6 = vunpack.c.0.s8 %v202_v4  ;;  %p466_p8 = scmp.ne.s32.totalorder %s249_s29, %s465_s6  ;;  %s469_s8 = sshll.u32 %s551_s7, 4  ;;  %s470_s8 = int_to_ptr.vmem [resolvable:$false] %s469_s8 }
  0x2f   : > { %s471_s12 = scalar_lea.vmem %s470_s8, 256  ;;  %p472_p0 = scmp.lt.s32.totalorder %s249_s29, %s470_s8 }
  0x30   : > { %432 = vset.pattern.permute.xlu0 %v549_v2  ;;  %v206_v8 = vsub.s32 %v203_v6, %v205_v7  ;;  %p467_p11 = pnand %p466_p8, %p618_p9  ;;  %p473_p1 = scmp.lt.s32.totalorder %s471_s12, %s465_s6 }
  0x31   : > { %211 = vperm.xlu0 %432, %v196_v1  }
  0x32   : > { %p468_p12 = pneg %p467_p11  ;;  %p474_p2 = por %p473_p1, %p472_p0 }
  0x34   : > { %p475_p3 = pnand %p474_p2, %p468_p12 }
  0xa7   : > { %v200_v9 = vpop.permute.xlu0 %199 }
  0xa8   : > { %v207_v10 = vrot.slane %v200_v9, %v206_v8 }
  0xaa   : > { %v209_v13 = vmul.f32 %v207_v10, %v195_v11 }
  0xac   : > { %v212_v12 = vpop.permute.xlu0 %211 }
  0xad   : > { %v219_v14 = vrot.slane %v212_v12, %v206_v8 }
  0xaf   : > { %v221_v15 = vadd.f32 %v219_v14, %v209_v13 }
  0xb1   : > { %v358_v16 = vmul.f32 -1.442695, %v221_v15 }
  0xb3   : > { %433 = vpow2.f32 %v358_v16 }
  0xc0   : > { %v434_v17 = vpop.eup %433 }
  0xc1   : > { %v225_v18 = vadd.f32 1.0, %v434_v17 }
  0xc3   : > { %435 = vrcp.f32 %v225_v18 }
  0xd0   : > { %v436_v19 = vpop.eup %435 }
  0xd1   : > { %v228_v20 = vmul.f32 %v436_v19, %v195_v11 }
  0xd3   : > { %v229_v21 = vadd.f32 %v228_v20, %v195_v11 }
  0xd5   : > { %230 = vst [vmem:[%s190_s28] sm:$0xff] %v229_v21 }
  0xd6   : > { %478 = shalt.err (!%p475_p3)
}
  0xd7   : > { %s479_s15 = scalar_lea.hbm %s246_s4, 128  ;;  %s483_s19 = scalar_lea.hbm %s710_s2, 256 }
  0xd8   : > { %p480_p5 = scmp.ne.s32.totalorder %s246_s4, %s479_s15  ;;  %p484_p10 = scmp.lt.s32.totalorder %s246_s4, %s710_s2 }
  0xd9   : > { %p485_p4 = scmp.lt.s32.totalorder %s483_s19, %s479_s15 }
  0xda   : > { %p481_p6 = pnand %p480_p5, %p618_p9 }
  0xdb   : > { %p486_p13 = por %p485_p4, %p484_p10 }
  0xdc   : > { %p482_p7 = pneg %p481_p6 }
  0xde   : > { %p487_p8 = pnand %p486_p13, %p482_p7 }
  0xe0   : > { %490 = shalt.err (!%p487_p8)
}
  0xe1   : > { %368 = dma.vmem_to_hbm [thread:$0]  (%p618_p9), %s249_s29, 128, %s246_s4, %s232_s5  }
  0xe2 PF: > { %s260_s26 = sand.u32 1, %s525_s9   ;;  %p716_p11 = scmp.ne.s32.totalorder %s714_s24, 0 }
  0xe3   : > { %p717_p12 = scmp.ge.s32.totalorder %s545_s14, 2  ;;  %s261_s27 = scalar_lea.sflag [#allocation4], %s260_s26 }
  0xe5   : > { %p375_p0 = pnand %p717_p12, %p716_p11 }
  0xe7   : > { %p376_p1 = pneg %p375_p0 }
  0xe9   : > { %520 = dma.done.wait (%p376_p1), %s261_s27, 128  }
  0xea   : > { %522 = vsyncadd (%p376_p1), %s261_s27, 4294967168  ;;  %s18_s14 = sadd.s32 1, %s545_s14   ;;  %s718_s9 = smov %s529_s10 }
  0xeb   : > { %p15_p2 = scmp.ge.s32.totalorder %s18_s14, 4   ;;  %s719_s10 = smov %s533_s11 }
  0xec   : > { %s720_s11 = smov %s623_s23  ;;  %s721_s12 = smov %s541_s13 }
  0xed   : > { %s722_s13 = smov %s724_s17  ;;  %17 = sbr.rel (!%p15_p2) target bundleno = 6 (0x6), region = 76 }
  0xf2   :  { %266 = vsyncpa [#allocation3], 1 }
  0xf3   :  { %268 = vsyncpa [#allocation3 + $0x1], 1 }
  0xf4   :  { %269 = vsyncpa [#allocation4], 1 }
  0xf5   :  { %271 = vsyncpa [#allocation4 + $0x1], 1 }

</bundles_post_ra>
